<compile_context>
chip_gen: v6e
topology: v6e:2x2x1
jax: 0.10.0
libtpu: 0.0.40
codegen_flags: <defaults>
</compile_context>

<pallas_src>
import functools

import jax
import jax.numpy as jnp
from jax.experimental import pallas as pl
from jax.experimental.pallas import tpu as pltpu

_MiB = 1024 * 1024


@functools.lru_cache(maxsize=1)
def _vmem_capacity_bytes():
    """Generation-aware VMEM capacity (128 MiB v5e/v6e, 64 MiB per-TC v7x)."""
    try:
        info = pltpu.get_tpu_info()
        cap = getattr(info, "vmem_capacity_bytes", None)
        if cap:
            return int(cap)
    except Exception:
        pass
    return 64 * _MiB  # conservative fallback, safe on every generation


def _spec(block_shape, index_map, *, single_buffer=False):
    """BlockSpec; optionally single-buffered for inner-axis-invariant tiles."""
    if single_buffer:
        try:
            return pl.BlockSpec(block_shape, index_map,
                                pipeline_mode=pl.Buffered(1))
        except Exception:  # pipeline_mode/Buffered unavailable -> default (2)
            pass
    return pl.BlockSpec(block_shape, index_map)


def _pick_tile(dim, candidates=(512, 256, 128)):
    """Largest MXU-friendly tile dividing `dim` (256-aligned preferred on
    v6e/v7x's 256x256 MXU), else the full extent (always a legal block dim)."""
    for c in candidates:
        if dim >= c and dim % c == 0:
            return c
    return dim


def _fused_linear_kernel(x_ref, w_ref, b_ref, o_ref):
    """One (tm, tn) output tile, full-K dot + bias, no scratch, no phases."""
    o_ref[...] = (
        jnp.dot(x_ref[...], w_ref[...], preferred_element_type=jnp.float32)
        + b_ref[...]
    ).astype(o_ref.dtype)


def _ktiled_linear_kernel(x_ref, w_ref, b_ref, o_ref, acc_ref):
    """General path: reduce over the K grid axis into an f32 accumulator."""
    k = pl.program_id(2)

    @pl.when(k == 0)
    def _():
        acc_ref[...] = jnp.zeros_like(acc_ref)

    acc_ref[...] += jnp.dot(
        x_ref[...], w_ref[...], preferred_element_type=jnp.float32
    )

    @pl.when(k == pl.num_programs(2) - 1)
    def _():
        o_ref[...] = (acc_ref[...] + b_ref[...]).astype(o_ref.dtype)


@jax.jit
def my_module_forward(data, weight, bias):
    M, K = data.shape
    K2, N = weight.shape
    assert K == K2 and bias.shape == (1, N)
    itemsize = 4  # f32

    vmem_cap = _vmem_capacity_bytes()
    fused_gate = int(vmem_cap * 0.75)  # fused path allowed up to ~75% of VMEM

    tm = _pick_tile(M)
    tn = _pick_tile(N)

    # Give v7x's second TensorCore a parallel axis to shard: if the grid would
    # collapse to (1, 1) on a big-enough problem, split M (or N) in two.
    if pl.cdiv(M, tm) == 1 and pl.cdiv(N, tn) == 1:
        if M >= 256 and (M // 2) % 8 == 0:
            tm = M // 2
        elif N >= 256 and (N // 2) % 128 == 0:
            tn = N // 2

    n_m_tiles = pl.cdiv(M, tm)
    n_n_tiles = pl.cdiv(N, tn)

    # Keep the *larger* operand resident in VMEM across the inner sweep and
    # stream the smaller one (fewest redundant HBM bytes).
    x_resident = (M * K) > (K * N)

    if x_resident:
        # x tile counted once (single-buffered resident), w/bias/out x2.
        fused_bytes = itemsize * (tm * K + 2 * (K * tn + tn) + 2 * tm * tn)
        fused_bytes_accessed = itemsize * (
            M * K + n_m_tiles * K * N + n_m_tiles * N + M * N
        )
    else:
        # weight + bias counted once (single-buffered resident), x/out x2.
        fused_bytes = itemsize * (2 * tm * K + K * tn + tn + 2 * tm * tn)
        fused_bytes_accessed = itemsize * (
            n_n_tiles * M * K + K * N + N + M * N
        )

    if fused_bytes <= fused_gate:
        # ---- Fast path: whole K in one step, single fused dot + bias. ----
        vmem_limit = min(max(2 * fused_bytes, 16 * _MiB), int(vmem_cap * 0.75))
        cost = pl.CostEstimate(
            flops=2 * M * N * K,
            transcendentals=0,
            bytes_accessed=fused_bytes_accessed,
        )
        if x_resident:
            # Outer axis sweeps M; (tm, K) x tile stays resident while the
            # (K, tn) weight tile streams along the inner N axis.
            grid = (n_m_tiles, n_n_tiles)
            in_specs = [
                _spec((tm, K), lambda i, j: (i, 0), single_buffer=True),
                pl.BlockSpec((K, tn), lambda i, j: (0, j)),
                pl.BlockSpec((1, tn), lambda i, j: (0, j)),
            ]
            out_spec = pl.BlockSpec((tm, tn), lambda i, j: (i, j))
        else:
            # Outer axis sweeps N; (K, tn) weight and (1, tn) bias stay
            # resident while the (tm, K) activation tile streams along M.
            grid = (n_n_tiles, n_m_tiles)
            in_specs = [
                pl.BlockSpec((tm, K), lambda j, i: (i, 0)),
                _spec((K, tn), lambda j, i: (0, j), single_buffer=True),
                _spec((1, tn), lambda j, i: (0, j), single_buffer=True),
            ]
            out_spec = pl.BlockSpec((tm, tn), lambda j, i: (i, j))

        return pl.pallas_call(
            _fused_linear_kernel,
            out_shape=jax.ShapeDtypeStruct((M, N), data.dtype),
            grid_spec=pltpu.PrefetchScalarGridSpec(
                num_scalar_prefetch=0,
                grid=grid,
                in_specs=in_specs,
                out_specs=out_spec,
            ),
            compiler_params=pltpu.CompilerParams(
                dimension_semantics=("parallel", "parallel"),
                vmem_limit_bytes=vmem_limit,
            ),
            cost_estimate=cost,
        )(data, weight, bias)

    # ---- General path: full-K slab too large -> tiled K reduction. ----
    if vmem_cap >= 96 * _MiB:           # v5e / v6e: spend the 128 MiB
        tk_candidates = (4096, 2048, 1024, 512, 256, 128, 8)
    else:                               # v7x: 64 MiB per TC, stay smaller
        tk_candidates = (1024, 512, 256, 128, 8)

    tk = None
    footprint = 0
    for cand in tk_candidates:
        if K >= cand and K % cand == 0:
            footprint = itemsize * (
                2 * (tm * cand + cand * tn + tn)  # double-buffered x/w/bias
                + tm * tn                          # f32 accumulator
                + 2 * tm * tn                      # output double buffer
            )
            if footprint <= fused_gate:
                tk = cand
                break
    if tk is None:  # extreme fallback; tiles still divide their dims
        tk = _pick_tile(K, candidates=(256, 128, 8))
        footprint = itemsize * (2 * (tm * tk + tk * tn + tn) + 3 * tm * tn)

    # Tile sizes are either exact divisors or the full extent, so padded
    # garbage can never be accumulated on the reduction (K) axis.
    grid = (n_m_tiles, n_n_tiles, pl.cdiv(K, tk))
    vmem_limit = min(max(2 * footprint, 32 * _MiB), int(vmem_cap * 0.75))
    cost = pl.CostEstimate(
        flops=2 * M * N * K,
        transcendentals=0,
        bytes_accessed=itemsize * (
            n_n_tiles * M * K + n_m_tiles * K * N + n_m_tiles * N + M * N
        ),
    )

    return pl.pallas_call(
        _ktiled_linear_kernel,
        out_shape=jax.ShapeDtypeStruct((M, N), data.dtype),
        grid_spec=pltpu.PrefetchScalarGridSpec(
            num_scalar_prefetch=0,
            grid=grid,
            in_specs=[
                pl.BlockSpec((tm, tk), lambda i, j, k: (i, k)),   # x tile
                pl.BlockSpec((tk, tn), lambda i, j, k: (k, j)),   # weight tile
                pl.BlockSpec((1, tn), lambda i, j, k: (0, j)),    # bias tile
            ],
            out_specs=pl.BlockSpec((tm, tn), lambda i, j, k: (i, j)),
            scratch_shapes=[pltpu.VMEM((tm, tn), jnp.float32)],
        ),
        compiler_params=pltpu.CompilerParams(
            dimension_semantics=("parallel", "parallel", "arbitrary"),
            vmem_limit_bytes=vmem_limit,
        ),
        cost_estimate=cost,
    )(data, weight, bias)


if __name__ == "__main__":
    # Deterministic parameter / input construction (synthetic; no checkpoint).
    in_features = 256
    out_features = 128
    batch = 128

    key = jax.random.PRNGKey(0)
    k_data, k_w, k_b = jax.random.split(key, 3)

    data = jax.random.normal(k_data, (batch, in_features), dtype=jnp.float32)
    # torch.rand -> uniform [0, 1)
    weight = jax.random.uniform(k_w, (in_features, out_features), dtype=jnp.float32)
    bias = jax.random.uniform(k_b, (1, out_features), dtype=jnp.float32)
    # TODO(synk): self.tens and self.fc1 (nn.Linear) are defined in __init__
    # but never used in forward(); intentionally not implemented.

    out = my_module_forward(data, weight, bias)
    jax.block_until_ready(out)

    # Correctness check against plain JAX reference.
    ref = data @ weight + bias
    assert out.shape == (batch, out_features)
    assert jnp.allclose(out, ref, atol=1e-4, rtol=1e-4), "mismatch vs reference"

    print("KERNEL_OK")
</pallas_src>

<mosaic_0001>
module attributes {stable_mosaic.version = 11 : i64} {
  func.func @_fused_linear_kernel(%arg0: i32, %arg1: i32, %arg2: memref<128x256xf32, #tpu.memory_space<vmem>>, %arg3: memref<256x128xf32, #tpu.memory_space<vmem>>, %arg4: memref<1x128xf32, #tpu.memory_space<vmem>>, %arg5: memref<128x128xf32, #tpu.memory_space<vmem>>) attributes {dimension_semantics = [#tpu.dimension_semantics<parallel>, #tpu.dimension_semantics<parallel>], iteration_bounds = array<i64: 1, 1>, scalar_prefetch = 0 : i64, scratch_operands = 0 : i64, tpu.core_type = #tpu.core_type<tc>, window_params = [{transform_indices = @transform_0, window_bounds = array<i64: 128, 256>}, {pipeline_mode = #tpu.pipeline_mode<synchronous>, transform_indices = @transform_1, window_bounds = array<i64: 256, 128>}, {pipeline_mode = #tpu.pipeline_mode<synchronous>, transform_indices = @transform_2, window_bounds = array<i64: 1, 128>}, {transform_indices = @transform_3, window_bounds = array<i64: 128, 128>}]} {
    %c0 = arith.constant 0 : index
    %c0_0 = arith.constant 0 : index
    %0 = vector.load %arg2[%c0, %c0_0] : memref<128x256xf32, #tpu.memory_space<vmem>>, vector<128x256xf32>
    %c0_1 = arith.constant 0 : index
    %c0_2 = arith.constant 0 : index
    %1 = vector.load %arg3[%c0_1, %c0_2] : memref<256x128xf32, #tpu.memory_space<vmem>>, vector<256x128xf32>
    %cst = arith.constant dense<0.000000e+00> : vector<128x128xf32>
    %2 = tpu.matmul %0, %1, %cst {dimension_numbers = #tpu.dot_dimension_numbers<[1], [0], [0], [1], [0, 0, 1, 1], [], []>} : vector<128x256xf32>, vector<256x128xf32>, vector<128x128xf32> -> vector<128x128xf32>
    %c0_3 = arith.constant 0 : index
    %c0_4 = arith.constant 0 : index
    %3 = vector.load %arg4[%c0_3, %c0_4] : memref<1x128xf32, #tpu.memory_space<vmem>>, vector<1x128xf32>
    %4 = vector.broadcast %3 : vector<1x128xf32> to vector<128x128xf32>
    %5 = arith.addf %2, %4 : vector<128x128xf32>
    %c0_5 = arith.constant 0 : index
    %c0_6 = arith.constant 0 : index
    %6 = vector.load %arg5[%c0_5, %c0_6] : memref<128x128xf32, #tpu.memory_space<vmem>>, vector<128x128xf32>
    tpu.vector_store %arg5[%c0_5, %c0_6], %5 {strides = array<i32>} : memref<128x128xf32, #tpu.memory_space<vmem>>, vector<128x128xf32>,
    return
  }
  func.func @transform_0(%arg0: i32, %arg1: i32) -> (i32, i32) {
    %c0_i32 = arith.constant 0 : i32
    %c0_i32_0 = arith.constant 0 : i32
    return %arg1, %c0_i32 : i32, i32
  }
  func.func @transform_1(%arg0: i32, %arg1: i32) -> (i32, i32) {
    %c0_i32 = arith.constant 0 : i32
    %c0_i32_0 = arith.constant 0 : i32
    return %c0_i32, %arg0 : i32, i32
  }
  func.func @transform_2(%arg0: i32, %arg1: i32) -> (i32, i32) {
    %c0_i32 = arith.constant 0 : i32
    %c0_i32_0 = arith.constant 0 : i32
    return %c0_i32, %arg0 : i32, i32
  }
  func.func @transform_3(%arg0: i32, %arg1: i32) -> (i32, i32) {
    %c0_i32 = arith.constant 0 : i32
    return %arg1, %arg0 : i32, i32
  }
}

</mosaic_0001>

<bundles_post_ra>
// kernel: my_module_forward.1
= control target key start
LH: loop header
LB: loop body
LE: loop exit
PB: predicated region body
PF: predicated region fallthrough
CT: control target
= control target key end

     0   :  { %8 = vsyncpa [#allocation3], 0  ;;  %s542_s0 = inlined_call_operand.hbm [shape: f32[128,256], index: 0, kind: input, shape index: {}]   ;;  %s543_s1 = inlined_call_operand.hbm [shape: f32[256,128], index: 1, kind: input, shape index: {}]   ;;  %s544_s2 = inlined_call_operand.vmem [shape: f32[1,128], index: 2, kind: input, shape index: {}]   ;;  %s545_s3 = inlined_call_operand.hbm [shape: f32[128,128], index: 3, kind: output, shape index: {}]  }
   0x1   :  { %9 = vsyncpa [#allocation6], 0 }
   0x2   :  { %10 = vsyncpa [#allocation4], 0  ;;  %s479_s12 = smov [#allocation2]  }
   0x3   :  { %s16_s13 = sshll.u32 %s479_s12, 4  ;;  %s17_s13 = int_to_ptr.vmem [resolvable:$true] %s16_s13 }
   0x4   :  { %s421_s14 = scalar_lea.vmem %s17_s13, 4096  ;;  %p426_p1 = scmp.lt.s32.totalorder %s17_s13, %s17_s13 }
   0x5   :  { %p422_p0 = scmp.ne.s32.totalorder %s17_s13, %s421_s14  ;;  %p427_p2 = scmp.lt.s32.totalorder %s421_s14, %s421_s14 }
   0x7   :  { %p428_p3 = por %p427_p2, %p426_p1 }
   0x9   :  { %p429_p4 = pnand %p428_p3, %p422_p0 }
   0xb   :  { %432 = shalt.err (!%p429_p4)
}
   0xc   :  { %s480_s15 = smov 256   ;;  %s481_s16 = smov 16  }
   0xd   :  { %22 = dma.hbm_to_vmem [thread:$0]  %s542_s0, 4096, %s17_s13, [#allocation3], %s480_s15, %s480_s15, %s481_s16  }
   0xe   :  { %s482_s19 = smov [#allocation5]  }
   0xf   :  { %s28_s20 = sshll.u32 %s482_s19, 4  ;;  %s29_s20 = int_to_ptr.vmem [resolvable:$true] %s28_s20 }
  0x10   :  { %s441_s21 = scalar_lea.vmem %s29_s20, 4096  ;;  %p446_p6 = scmp.lt.s32.totalorder %s29_s20, %s29_s20 }
  0x11   :  { %p442_p5 = scmp.ne.s32.totalorder %s29_s20, %s441_s21  ;;  %p447_p7 = scmp.lt.s32.totalorder %s441_s21, %s441_s21 }
  0x13   :  { %p448_p8 = por %p447_p7, %p446_p6 }
  0x15   :  { %p449_p9 = pnand %p448_p8, %p442_p5 }
  0x17   :  { %452 = shalt.err (!%p449_p9)
}
  0x18   :  { %s483_s22 = smov 128   ;;  %s484_s23 = smov 8  }
  0x19   :  { %34 = dma.hbm_to_vmem [thread:$0]  %s543_s1, 4096, %s29_s20, [#allocation6], %s483_s22, %s483_s22, %s484_s23  }
  0x1a   :  { %473 = dma.done.wait [#allocation3], 4096  }
  0x1b   :  { %474 = vsyncadd [#allocation3], 4294963200 }
  0x1c   :  { %475 = dma.done.wait [#allocation6], 4096  }
  0x1d   :  { %476 = vsyncadd [#allocation6], 4294963200  ;;  %v106_v0 = vld [vmem:[#allocation5 + $0xf8] sm:$0xff]  ;;  %v105_v2 = vld [vmem:[#allocation5 + $0xf0] sm:$0xff] }
  0x1e   :  { %v90_v1 = vld [vmem:[#allocation5 + $0x78] sm:$0xff]  ;;  %294 = vmatprep.subr.mxu0 %v106_v0  ;;  %374 = vmatprep.subr.mxu1 %v106_v0  ;;  %v89_v3 = vld [vmem:[#allocation5 + $0x70] sm:$0xff]  ;;  %v104_v4 = vld [vmem:[#allocation5 + $0xe8] sm:$0xff] }
  0x1f   :  { %295 = vmatpush3.msra.mxu0 %v90_v1  ;;  %390 = vmatpush3.msra.mxu1 %v90_v1  ;;  %v88_v5 = vld [vmem:[#allocation5 + $0x68] sm:$0xff]  ;;  %v103_v6 = vld [vmem:[#allocation5 + $0xe0] sm:$0xff]  ;;  %v102_v8 = vld [vmem:[#allocation5 + $0xd8] sm:$0xff] }
  0x20   :  { %296 = vmatprep.subr.mxu0 %v105_v2  ;;  %375 = vmatprep.subr.mxu1 %v105_v2  ;;  %v87_v7 = vld [vmem:[#allocation5 + $0x60] sm:$0xff]  ;;  %v86_v9 = vld [vmem:[#allocation5 + $0x58] sm:$0xff]  ;;  %v101_v10 = vld [vmem:[#allocation5 + $0xd0] sm:$0xff] }
  0x21   :  { %297 = vmatpush3.msra.mxu0 %v89_v3  ;;  %391 = vmatpush3.msra.mxu1 %v89_v3  ;;  %v85_v11 = vld [vmem:[#allocation5 + $0x50] sm:$0xff]  ;;  %v100_v12 = vld [vmem:[#allocation5 + $0xc8] sm:$0xff]  ;;  %v99_v14 = vld [vmem:[#allocation5 + $0xc0] sm:$0xff] }
  0x22   :  { %298 = vmatprep.subr.mxu0 %v104_v4  ;;  %376 = vmatprep.subr.mxu1 %v104_v4  ;;  %v84_v13 = vld [vmem:[#allocation5 + $0x48] sm:$0xff]  ;;  %v83_v15 = vld [vmem:[#allocation5 + $0x40] sm:$0xff]  ;;  %v98_v16 = vld [vmem:[#allocation5 + $0xb8] sm:$0xff] }
  0x23   :  { %299 = vmatpush3.msra.mxu0 %v88_v5  ;;  %392 = vmatpush3.msra.mxu1 %v88_v5  ;;  %v82_v17 = vld [vmem:[#allocation5 + $0x38] sm:$0xff]  ;;  %v97_v18 = vld [vmem:[#allocation5 + $0xb0] sm:$0xff]  ;;  %v96_v20 = vld [vmem:[#allocation5 + $0xa8] sm:$0xff] }
  0x24   :  { %300 = vmatprep.subr.mxu0 %v103_v6  ;;  %377 = vmatprep.subr.mxu1 %v103_v6  ;;  %v81_v19 = vld [vmem:[#allocation5 + $0x30] sm:$0xff]  ;;  %v80_v21 = vld [vmem:[#allocation5 + $0x28] sm:$0xff]  ;;  %v95_v22 = vld [vmem:[#allocation5 + $0xa0] sm:$0xff] }
  0x25   :  { %301 = vmatpush3.msra.mxu0 %v87_v7  ;;  %393 = vmatpush3.msra.mxu1 %v87_v7  ;;  %v79_v23 = vld [vmem:[#allocation5 + $0x20] sm:$0xff]  ;;  %v94_v24 = vld [vmem:[#allocation5 + $0x98] sm:$0xff]  ;;  %v93_v26 = vld [vmem:[#allocation5 + $0x90] sm:$0xff] }
  0x26   :  { %302 = vmatprep.subr.mxu0 %v102_v8  ;;  %378 = vmatprep.subr.mxu1 %v102_v8  ;;  %v78_v25 = vld [vmem:[#allocation5 + $0x18] sm:$0xff]  ;;  %v77_v27 = vld [vmem:[#allocation5 + $0x10] sm:$0xff]  ;;  %v92_v28 = vld [vmem:[#allocation5 + $0x88] sm:$0xff] }
  0x27   :  { %303 = vmatpush3.msra.mxu0 %v86_v9  ;;  %394 = vmatpush3.msra.mxu1 %v86_v9  ;;  %v76_v29 = vld [vmem:[#allocation5 + $0x8] sm:$0xff]  ;;  %v91_v30 = vld [vmem:[#allocation5 + $0x80] sm:$0xff]  ;;  %v46_v36 = vld [vmem:[#allocation2 + $0x18] sm:$0xff] }
  0x28   :  { %304 = vmatprep.subr.mxu0 %v101_v10  ;;  %379 = vmatprep.subr.mxu1 %v101_v10  ;;  %v75_v31 = vld [vmem:[#allocation5] sm:$0xff]  ;;  %v44_v32 = vld [vmem:[#allocation2 + $0x8] sm:$0xff]  ;;  %v62_v37 = vld [vmem:[#allocation2 + $0x98] sm:$0xff] }
  0x29   :  { %305 = vmatpush3.msra.mxu0 %v85_v11  ;;  %395 = vmatpush3.msra.mxu1 %v85_v11  ;;  %v60_v33 = vld [vmem:[#allocation2 + $0x88] sm:$0xff]  ;;  %v43_v34 = vld [vmem:[#allocation2] sm:$0xff]  ;;  %v45_v38 = vld [vmem:[#allocation2 + $0x10] sm:$0xff] }
  0x2a   :  { %306 = vmatprep.subr.mxu0 %v100_v12  ;;  %380 = vmatprep.subr.mxu1 %v100_v12  ;;  %v59_v35 = vld [vmem:[#allocation2 + $0x80] sm:$0xff]  ;;  %v61_v39 = vld [vmem:[#allocation2 + $0x90] sm:$0xff]  ;;  %v48_v40 = vld [vmem:[#allocation2 + $0x28] sm:$0xff] }
  0x2b   :  { %307 = vmatpush3.msra.mxu0 %v84_v13  ;;  %396 = vmatpush3.msra.mxu1 %v84_v13  ;;  %v64_v41 = vld [vmem:[#allocation2 + $0xa8] sm:$0xff]  ;;  %v47_v42 = vld [vmem:[#allocation2 + $0x20] sm:$0xff]  ;;  %v50_v44 = vld [vmem:[#allocation2 + $0x38] sm:$0xff] }
  0x2c   :  { %308 = vmatprep.subr.mxu0 %v99_v14  ;;  %381 = vmatprep.subr.mxu1 %v99_v14  ;;  %v63_v43 = vld [vmem:[#allocation2 + $0xa0] sm:$0xff]  ;;  %v66_v45 = vld [vmem:[#allocation2 + $0xb8] sm:$0xff]  ;;  %v49_v46 = vld [vmem:[#allocation2 + $0x30] sm:$0xff] }
  0x2d   :  { %309 = vmatpush3.msra.mxu0 %v83_v15  ;;  %397 = vmatpush3.msra.mxu1 %v83_v15  ;;  %v65_v47 = vld [vmem:[#allocation2 + $0xb0] sm:$0xff]  ;;  %v52_v48 = vld [vmem:[#allocation2 + $0x48] sm:$0xff]  ;;  %v51_v50 = vld [vmem:[#allocation2 + $0x40] sm:$0xff] }
  0x2e   :  { %310 = vmatprep.subr.mxu0 %v98_v16  ;;  %382 = vmatprep.subr.mxu1 %v98_v16  ;;  %v68_v49 = vld [vmem:[#allocation2 + $0xc8] sm:$0xff]  ;;  %v67_v51 = vld [vmem:[#allocation2 + $0xc0] sm:$0xff]  ;;  %v54_v52 = vld [vmem:[#allocation2 + $0x58] sm:$0xff] }
  0x2f   :  { %311 = vmatpush3.msra.mxu0 %v82_v17  ;;  %398 = vmatpush3.msra.mxu1 %v82_v17  ;;  %v70_v53 = vld [vmem:[#allocation2 + $0xd8] sm:$0xff]  ;;  %v53_v54 = vld [vmem:[#allocation2 + $0x50] sm:$0xff]  ;;  %v56_v56 = vld [vmem:[#allocation2 + $0x68] sm:$0xff] }
  0x30   :  { %312 = vmatprep.subr.mxu0 %v97_v18  ;;  %383 = vmatprep.subr.mxu1 %v97_v18  ;;  %v69_v55 = vld [vmem:[#allocation2 + $0xd0] sm:$0xff]  ;;  %v72_v57 = vld [vmem:[#allocation2 + $0xe8] sm:$0xff]  ;;  %v55_v58 = vld [vmem:[#allocation2 + $0x60] sm:$0xff] }
  0x31   :  { %313 = vmatpush3.msra.mxu0 %v81_v19  ;;  %399 = vmatpush3.msra.mxu1 %v81_v19  ;;  %v71_v59 = vld [vmem:[#allocation2 + $0xe0] sm:$0xff]  ;;  %v58_v60 = vld [vmem:[#allocation2 + $0x78] sm:$0xff]  ;;  %v57_v62 = vld [vmem:[#allocation2 + $0x70] sm:$0xff] }
  0x32   :  { %314 = vmatprep.subr.mxu0 %v96_v20  ;;  %384 = vmatprep.subr.mxu1 %v96_v20  ;;  %v74_v61 = vld [vmem:[#allocation2 + $0xf8] sm:$0xff]  ;;  %v73_v63 = vld [vmem:[#allocation2 + $0xf0] sm:$0xff]  ;;  %v518_v2 = vld [vmem:[%s544_s2] ss:$0 sm:$0xff]  ;;  %s485_s2 = smov [#allocation7]  }
  0x33   :  { %315 = vmatpush3.msra.mxu0 %v80_v21  ;;  %400 = vmatpush3.msra.mxu1 %v80_v21  ;;  %s280_s26 = sshll.u32 %s485_s2, 4  ;;  %s281_s26 = int_to_ptr.vmem [resolvable:$true] %s280_s26 }
  0x34   :  { %316 = vmatprep.subr.mxu0 %v95_v22  ;;  %385 = vmatprep.subr.mxu1 %v95_v22  ;;  %s453_s27 = scalar_lea.vmem %s281_s26, 2048  ;;  %p458_p11 = scmp.lt.s32.totalorder %s281_s26, %s281_s26 }
  0x35   :  { %317 = vmatpush3.msra.mxu0 %v79_v23  ;;  %401 = vmatpush3.msra.mxu1 %v79_v23  ;;  %p454_p10 = scmp.ne.s32.totalorder %s281_s26, %s453_s27  ;;  %p459_p12 = scmp.lt.s32.totalorder %s453_s27, %s453_s27 }
  0x36   :  { %318 = vmatprep.subr.mxu0 %v94_v24  ;;  %386 = vmatprep.subr.mxu1 %v94_v24 }
  0x37   :  { %319 = vmatpush3.msra.mxu0 %v78_v25  ;;  %402 = vmatpush3.msra.mxu1 %v78_v25  ;;  %p460_p13 = por %p459_p12, %p458_p11 }
  0x38   :  { %320 = vmatprep.subr.mxu0 %v93_v26  ;;  %387 = vmatprep.subr.mxu1 %v93_v26 }
  0x39   :  { %321 = vmatpush3.msra.mxu0 %v77_v27  ;;  %403 = vmatpush3.msra.mxu1 %v77_v27  ;;  %p461_p0 = pnand %p460_p13, %p454_p10 }
  0x3a   :  { %322 = vmatprep.subr.mxu0 %v92_v28  ;;  %388 = vmatprep.subr.mxu1 %v92_v28 }
  0x3b   :  { %323 = vmatpush3.msra.mxu0 %v76_v29  ;;  %404 = vmatpush3.msra.mxu1 %v76_v29 }
  0x3c   :  { %324 = vmatprep.subr.mxu0 %v91_v30  ;;  %389 = vmatprep.subr.mxu1 %v91_v30 }
  0x3d   :  { %325 = vmatpush3.msra.mxu0 %v75_v31  ;;  %405 = vmatpush3.msra.mxu1 %v75_v31 }
  0x3e   :  { %178 = vmatprep.mubr.f32.mxu0 %v44_v32  ;;  %218 = vmatprep.mubr.f32.mxu1 %v60_v33 }
  0x3f   :  { %179 = vmatmul.mubr.f32.vlgmr.msra.gmra.mxu0 %v43_v34  ;;  %219 = vmatmul.mubr.f32.vlgmr.msra.gmra.mxu1 %v59_v35 }
  0x40   :  { %183 = vmatprep.mubr.f32.mxu0 %v46_v36  ;;  %223 = vmatprep.mubr.f32.mxu1 %v62_v37 }
  0x43   :  { %184 = vmatmul.mubr.f32.gmra.mxu0 %v45_v38  ;;  %224 = vmatmul.mubr.f32.gmra.mxu1 %v61_v39 }
  0x44   :  { %188 = vmatprep.mubr.f32.mxu0 %v48_v40  ;;  %228 = vmatprep.mubr.f32.mxu1 %v64_v41 }
  0x47   :  { %189 = vmatmul.mubr.f32.gmra.mxu0 %v47_v42  ;;  %229 = vmatmul.mubr.f32.gmra.mxu1 %v63_v43 }
  0x48   :  { %193 = vmatprep.mubr.f32.mxu0 %v50_v44  ;;  %233 = vmatprep.mubr.f32.mxu1 %v66_v45 }
  0x4b   :  { %194 = vmatmul.mubr.f32.gmra.mxu0 %v49_v46  ;;  %234 = vmatmul.mubr.f32.gmra.mxu1 %v65_v47 }
  0x4c   :  { %198 = vmatprep.mubr.f32.mxu0 %v52_v48  ;;  %238 = vmatprep.mubr.f32.mxu1 %v68_v49 }
  0x4f   :  { %199 = vmatmul.mubr.f32.gmra.mxu0 %v51_v50  ;;  %239 = vmatmul.mubr.f32.gmra.mxu1 %v67_v51 }
  0x50   :  { %203 = vmatprep.mubr.f32.mxu0 %v54_v52  ;;  %243 = vmatprep.mubr.f32.mxu1 %v70_v53 }
  0x53   :  { %204 = vmatmul.mubr.f32.gmra.mxu0 %v53_v54  ;;  %244 = vmatmul.mubr.f32.gmra.mxu1 %v69_v55 }
  0x54   :  { %208 = vmatprep.mubr.f32.mxu0 %v56_v56  ;;  %248 = vmatprep.mubr.f32.mxu1 %v72_v57 }
  0x57   :  { %209 = vmatmul.mubr.f32.gmra.mxu0 %v55_v58  ;;  %249 = vmatmul.mubr.f32.gmra.mxu1 %v71_v59 }
  0x58   :  { %213 = vmatprep.mubr.f32.mxu0 %v58_v60  ;;  %253 = vmatprep.mubr.f32.mxu1 %v74_v61 }
  0x5b   :  { %214 = vmatmul.mubr.f32.gmra.mxu0 %v57_v62  ;;  %254 = vmatmul.mubr.f32.gmra.mxu1 %v73_v63 }
  0xff   :  { %v326_v0 = vpop.f32.mrf.mxu0  ;;  %v350_v1 = vpop.f32.mrf.mxu1 }
 0x101   :  { %v327_v3 = vpop.f32.mrf.mxu0  ;;  %v351_v4 = vpop.f32.mrf.mxu1 }
 0x102   :  { %v328_v5 = vadd.f32 %v327_v3, %v326_v0  ;;  %v352_v6 = vadd.f32 %v351_v4, %v350_v1 }
 0x103   :  { %v329_v7 = vpop.f32.mrf.mxu0  ;;  %v353_v8 = vpop.f32.mrf.mxu1 }
 0x104   :  { %v181_v9 = vadd.f32 %v328_v5, %v518_v2  ;;  %v221_v10 = vadd.f32 %v352_v6, %v518_v2 }
 0x105   :  { %v330_v11 = vpop.f32.mrf.mxu0  ;;  %v354_v12 = vpop.f32.mrf.mxu1 }
 0x106   :  { %259 = vst [vmem:[#allocation7] sm:$0xff] %v181_v9  ;;  %267 = vst [vmem:[#allocation7 + $0x40] sm:$0xff] %v221_v10  ;;  %v331_v13 = vadd.f32 %v330_v11, %v329_v7  ;;  %v355_v14 = vadd.f32 %v354_v12, %v353_v8 }
 0x107   :  { %v332_v15 = vpop.f32.mrf.mxu0  ;;  %v356_v16 = vpop.f32.mrf.mxu1 }
 0x108   :  { %v186_v17 = vadd.f32 %v331_v13, %v518_v2  ;;  %v226_v18 = vadd.f32 %v355_v14, %v518_v2 }
 0x109   :  { %v333_v19 = vpop.f32.mrf.mxu0  ;;  %v357_v20 = vpop.f32.mrf.mxu1 }
 0x10a   :  { %260 = vst [vmem:[#allocation7 + $0x8] sm:$0xff] %v186_v17  ;;  %268 = vst [vmem:[#allocation7 + $0x48] sm:$0xff] %v226_v18  ;;  %v334_v21 = vadd.f32 %v333_v19, %v332_v15  ;;  %v358_v22 = vadd.f32 %v357_v20, %v356_v16 }
 0x10b   :  { %v335_v23 = vpop.f32.mrf.mxu0  ;;  %v359_v24 = vpop.f32.mrf.mxu1 }
 0x10c   :  { %v191_v25 = vadd.f32 %v334_v21, %v518_v2  ;;  %v231_v26 = vadd.f32 %v358_v22, %v518_v2 }
 0x10d   :  { %v336_v27 = vpop.f32.mrf.mxu0  ;;  %v360_v28 = vpop.f32.mrf.mxu1 }
 0x10e   :  { %261 = vst [vmem:[#allocation7 + $0x10] sm:$0xff] %v191_v25  ;;  %269 = vst [vmem:[#allocation7 + $0x50] sm:$0xff] %v231_v26  ;;  %v337_v29 = vadd.f32 %v336_v27, %v335_v23  ;;  %v361_v30 = vadd.f32 %v360_v28, %v359_v24 }
 0x10f   :  { %v338_v31 = vpop.f32.mrf.mxu0  ;;  %v362_v32 = vpop.f32.mrf.mxu1 }
 0x110   :  { %v196_v33 = vadd.f32 %v337_v29, %v518_v2  ;;  %v236_v34 = vadd.f32 %v361_v30, %v518_v2 }
 0x111   :  { %v339_v35 = vpop.f32.mrf.mxu0  ;;  %v363_v36 = vpop.f32.mrf.mxu1 }
 0x112   :  { %262 = vst [vmem:[#allocation7 + $0x18] sm:$0xff] %v196_v33  ;;  %270 = vst [vmem:[#allocation7 + $0x58] sm:$0xff] %v236_v34  ;;  %v340_v37 = vadd.f32 %v339_v35, %v338_v31  ;;  %v364_v38 = vadd.f32 %v363_v36, %v362_v32 }
 0x113   :  { %v341_v39 = vpop.f32.mrf.mxu0  ;;  %v365_v40 = vpop.f32.mrf.mxu1 }
 0x114   :  { %v201_v41 = vadd.f32 %v340_v37, %v518_v2  ;;  %v241_v42 = vadd.f32 %v364_v38, %v518_v2 }
 0x115   :  { %v342_v43 = vpop.f32.mrf.mxu0  ;;  %v366_v44 = vpop.f32.mrf.mxu1 }
 0x116   :  { %263 = vst [vmem:[#allocation7 + $0x20] sm:$0xff] %v201_v41  ;;  %271 = vst [vmem:[#allocation7 + $0x60] sm:$0xff] %v241_v42  ;;  %v343_v45 = vadd.f32 %v342_v43, %v341_v39  ;;  %v367_v46 = vadd.f32 %v366_v44, %v365_v40 }
 0x117   :  { %v344_v47 = vpop.f32.mrf.mxu0  ;;  %v368_v48 = vpop.f32.mrf.mxu1 }
 0x118   :  { %v206_v49 = vadd.f32 %v343_v45, %v518_v2  ;;  %v246_v50 = vadd.f32 %v367_v46, %v518_v2 }
 0x119   :  { %v345_v51 = vpop.f32.mrf.mxu0  ;;  %v369_v52 = vpop.f32.mrf.mxu1 }
 0x11a   :  { %264 = vst [vmem:[#allocation7 + $0x28] sm:$0xff] %v206_v49  ;;  %272 = vst [vmem:[#allocation7 + $0x68] sm:$0xff] %v246_v50  ;;  %v346_v53 = vadd.f32 %v345_v51, %v344_v47  ;;  %v370_v54 = vadd.f32 %v369_v52, %v368_v48 }
 0x11b   :  { %v347_v55 = vpop.f32.mrf.mxu0  ;;  %v371_v56 = vpop.f32.mrf.mxu1 }
 0x11c   :  { %v211_v57 = vadd.f32 %v346_v53, %v518_v2  ;;  %v251_v58 = vadd.f32 %v370_v54, %v518_v2 }
 0x11d   :  { %v348_v59 = vpop.f32.mrf.mxu0  ;;  %v372_v60 = vpop.f32.mrf.mxu1 }
 0x11e   :  { %265 = vst [vmem:[#allocation7 + $0x30] sm:$0xff] %v211_v57  ;;  %273 = vst [vmem:[#allocation7 + $0x70] sm:$0xff] %v251_v58  ;;  %v349_v61 = vadd.f32 %v348_v59, %v347_v55  ;;  %v373_v62 = vadd.f32 %v372_v60, %v371_v56 }
 0x120   :  { %v216_v63 = vadd.f32 %v349_v61, %v518_v2  ;;  %v256_v0 = vadd.f32 %v373_v62, %v518_v2 }
 0x122   :  { %266 = vst [vmem:[#allocation7 + $0x38] sm:$0xff] %v216_v63  ;;  %274 = vst [vmem:[#allocation7 + $0x78] sm:$0xff] %v256_v0 }
 0x123   :  { %464 = shalt.err (!%p461_p0)
}
 0x124   :  { %286 = dma.vmem_to_hbm [thread:$0]  %s281_s26, 2048, %s545_s3, [#allocation4], %s483_s22, %s483_s22, %s484_s23  }
 0x125   :  { %477 = dma.done.wait [#allocation4], 2048  }
 0x126   :  { %478 = vsyncadd [#allocation4], 4294965248 }
 0x127   :  { %290 = vsyncpa [#allocation3], 1 }
 0x128   :  { %291 = vsyncpa [#allocation6], 1 }
 0x129   :  { %292 = vsyncpa [#allocation4], 1 }

</bundles_post_ra>
